<compile_context>
chip_gen: v6e
topology: v6e:2x2x1
jax: 0.10.0
libtpu: 0.0.40
codegen_flags: <defaults>
</compile_context>

<pallas_src>
import jax
import jax.numpy as jnp
from jax.experimental import pallas as pl
from jax.experimental.pallas import tpu as pltpu

IN_FEATURES = 3
OUT_FEATURES = 8
_LANE = 128


def _round_up(a, m):
    return ((a + m - 1) // m) * m


def _linear_gelu_kernel(x_ref, w_ref, b_ref, o_ref):
    # x_ref: (3, tm) VMEM   w_ref: (3, 8) SMEM   b_ref: (8,) SMEM
    # o_ref: (8, tm) VMEM
    for n in range(OUT_FEATURES):
        # v1[n, :] = b[n] + sum_k w[k, n] * xT[k, :]   (SMEM scalar * lane-dense row)
        v1 = (b_ref[n]
              + w_ref[0, n] * x_ref[0:1, :]
              + w_ref[1, n] * x_ref[1:2, :]
              + w_ref[2, n] * x_ref[2:3, :])
        v1_sq = v1 * v1
        v3 = v1 + v1 * v1_sq * 0.044715
        v2 = v3 * 0.7978845608028654
        v5 = jnp.tanh(v2) + 1.0            # tanh lands on the EUP slot (free next to VALU)
        o_ref[n:n + 1, :] = v1 * v5        # NOTE: no 0.5 factor -- matches the module


def linear_gelu_pallas(x, weight, bias, *, m_tile=4096):
    """x: (B, 3), weight: (3, 8), bias: (8,) -> (B, 8), all float32."""
    B, K = x.shape
    Kw, N = weight.shape
    assert K == IN_FEATURES and Kw == IN_FEATURES and N == OUT_FEATURES

    xT = jnp.asarray(x, jnp.float32).T               # (3, B): batch on the lane axis
    w = jnp.asarray(weight, jnp.float32)             # (3, 8) -> SMEM scalars
    b = jnp.asarray(bias, jnp.float32).reshape(N)    # (8,)   -> SMEM scalars

    if B <= 2 * _LANE:
        # Tiny batch: one block equal to the full array dims (legal for any B).
        tm = B
    else:
        # Lane-aligned tile; keep >= 2 grid steps so v7x can shard across its 2 TCs.
        tm = max(_LANE, min(m_tile, _round_up(pl.cdiv(B, 2), _LANE)))
    grid = (pl.cdiv(B, tm),)

    yT = pl.pallas_call(
        _linear_gelu_kernel,
        out_shape=jax.ShapeDtypeStruct((N, B), jnp.float32),
        grid=grid,
        in_specs=[
            pl.BlockSpec((K, tm), lambda i: (0, i)),              # x^T tile marches over batch
            pl.BlockSpec(memory_space=pltpu.MemorySpace.SMEM),    # weight stays in SMEM
            pl.BlockSpec(memory_space=pltpu.MemorySpace.SMEM),    # bias stays in SMEM
        ],
        out_specs=pl.BlockSpec((N, tm), lambda i: (0, i)),        # lane-dense y^T tile
        compiler_params=pltpu.CompilerParams(
            dimension_semantics=("parallel",),
        ),
    )(xT, w, b)

    return yT.T                                                   # back to (B, 8)


def _reference(x, weight, bias):
    x = x.astype(jnp.float32)
    # Pure-VPU f32 linear (avoids MXU default-precision ambiguity in the reference).
    v1 = (x[:, :, None] * weight[None, :, :]).sum(axis=1) + bias
    v3 = v1 + v1 * v1 * v1 * 0.044715
    v2 = v3 * 0.7978845608028654
    v4 = jnp.tanh(v2)
    v5 = v4 + 1.0
    return v1 * v5


if __name__ == "__main__":
    key = jax.random.PRNGKey(0)
    kx, kw, kb, kx2, kx3 = jax.random.split(key, 5)

    # Deterministic Linear(3, 8) params (torch weight layout is (out, in)).
    bound = 1.0 / (IN_FEATURES ** 0.5)
    w_torch = jax.random.uniform(kw, (OUT_FEATURES, IN_FEATURES),
                                 jnp.float32, -bound, bound)
    bias = jax.random.uniform(kb, (OUT_FEATURES,), jnp.float32, -bound, bound)
    weight = w_torch.T                                # (in, out) so kernel does x @ W + b

    # Small batch consistent with the module's x1 = randn(1, 3); use batch=2.
    x = jax.random.normal(kx, (2, IN_FEATURES), jnp.float32)
    out = linear_gelu_pallas(x, weight, bias)
    jax.block_until_ready(out)
    ref = _reference(x, weight, bias)
    assert out.shape == (2, OUT_FEATURES)
    assert jnp.allclose(out, ref, atol=1e-5, rtol=1e-5)

    # Multi-step grid + ragged last block (B=300 -> tm=256, 2 steps, 44-col tail).
    xb = jax.random.normal(kx2, (300, IN_FEATURES), jnp.float32)
    outb = linear_gelu_pallas(xb, weight, bias)
    jax.block_until_ready(outb)
    refb = _reference(xb, weight, bias)
    assert outb.shape == (300, OUT_FEATURES)
    assert jnp.allclose(outb, refb, atol=1e-5, rtol=1e-5)

    # Large, exactly-dividing path (B=8192 -> tm=4096, 2 parallel steps).
    xc = jax.random.normal(kx3, (8192, IN_FEATURES), jnp.float32)
    outc = linear_gelu_pallas(xc, weight, bias)
    jax.block_until_ready(outc)
    refc = _reference(xc, weight, bias)
    assert outc.shape == (8192, OUT_FEATURES)
    assert jnp.allclose(outc, refc, atol=1e-5, rtol=1e-5)

    print("KERNEL_OK")
</pallas_src>

<mosaic_0001>
module attributes {stable_mosaic.version = 11 : i64} {
  func.func @_linear_gelu_kernel(%arg0: i32, %arg1: memref<3x2xf32, #tpu.memory_space<vmem>>, %arg2: memref<3x8xf32, #tpu.memory_space<smem>>, %arg3: memref<8xf32, #tpu.memory_space<smem>>, %arg4: memref<8x2xf32, #tpu.memory_space<vmem>>) attributes {dimension_semantics = [#tpu.dimension_semantics<parallel>], iteration_bounds = array<i64: 1>, scalar_prefetch = 0 : i64, scratch_operands = 0 : i64, tpu.core_type = #tpu.core_type<tc>, window_params = [{transform_indices = @transform_0, window_bounds = array<i64: 3, 2>}, {transform_indices = @transform_1, window_bounds = array<i64: 3, 8>}, {transform_indices = @transform_2, window_bounds = array<i64: 8>}, {transform_indices = @transform_3, window_bounds = array<i64: 8, 2>}]} {
    %c0 = arith.constant 0 : index
    %0 = memref.load %arg3[%c0] : memref<8xf32, #tpu.memory_space<smem>>
    %c0_0 = arith.constant 0 : index
    %c0_1 = arith.constant 0 : index
    %1 = memref.load %arg2[%c0_0, %c0_1] : memref<3x8xf32, #tpu.memory_space<smem>>
    %c0_2 = arith.constant 0 : index
    %c0_3 = arith.constant 0 : index
    %2 = vector.load %arg1[%c0_2, %c0_3] : memref<3x2xf32, #tpu.memory_space<vmem>>, vector<1x2xf32>
    %3 = vector.broadcast %1 : f32 to vector<1x2xf32>
    %4 = arith.mulf %3, %2 : vector<1x2xf32>
    %5 = vector.broadcast %0 : f32 to vector<1x2xf32>
    %6 = arith.addf %5, %4 : vector<1x2xf32>
    %c1 = arith.constant 1 : index
    %c0_4 = arith.constant 0 : index
    %7 = memref.load %arg2[%c1, %c0_4] : memref<3x8xf32, #tpu.memory_space<smem>>
    %c1_5 = arith.constant 1 : index
    %c0_6 = arith.constant 0 : index
    %8 = vector.load %arg1[%c1_5, %c0_6] : memref<3x2xf32, #tpu.memory_space<vmem>>, vector<1x2xf32>
    %9 = vector.broadcast %7 : f32 to vector<1x2xf32>
    %10 = arith.mulf %9, %8 : vector<1x2xf32>
    %11 = arith.addf %6, %10 : vector<1x2xf32>
    %c2 = arith.constant 2 : index
    %c0_7 = arith.constant 0 : index
    %12 = memref.load %arg2[%c2, %c0_7] : memref<3x8xf32, #tpu.memory_space<smem>>
    %c2_8 = arith.constant 2 : index
    %c0_9 = arith.constant 0 : index
    %13 = vector.load %arg1[%c2_8, %c0_9] : memref<3x2xf32, #tpu.memory_space<vmem>>, vector<1x2xf32>
    %14 = vector.broadcast %12 : f32 to vector<1x2xf32>
    %15 = arith.mulf %14, %13 : vector<1x2xf32>
    %16 = arith.addf %11, %15 : vector<1x2xf32>
    %17 = arith.mulf %16, %16 : vector<1x2xf32>
    %18 = arith.mulf %16, %17 : vector<1x2xf32>
    %cst = arith.constant 4.471500e-02 : f32
    %19 = vector.broadcast %cst : f32 to vector<1x2xf32>
    %20 = arith.mulf %18, %19 : vector<1x2xf32>
    %21 = arith.addf %16, %20 : vector<1x2xf32>
    %cst_10 = arith.constant 0.797884583 : f32
    %22 = vector.broadcast %cst_10 : f32 to vector<1x2xf32>
    %23 = arith.mulf %21, %22 : vector<1x2xf32>
    %24 = math.tanh %23 : vector<1x2xf32>
    %cst_11 = arith.constant 1.000000e+00 : f32
    %25 = vector.broadcast %cst_11 : f32 to vector<1x2xf32>
    %26 = arith.addf %24, %25 : vector<1x2xf32>
    %27 = arith.mulf %16, %26 : vector<1x2xf32>
    %c0_12 = arith.constant 0 : index
    %c0_13 = arith.constant 0 : index
    %28 = vector.load %arg4[%c0_12, %c0_13] : memref<8x2xf32, #tpu.memory_space<vmem>>, vector<1x2xf32>
    tpu.vector_store %arg4[%c0_12, %c0_13], %27 {strides = array<i32>} : memref<8x2xf32, #tpu.memory_space<vmem>>, vector<1x2xf32>,
    %c1_14 = arith.constant 1 : index
    %29 = memref.load %arg3[%c1_14] : memref<8xf32, #tpu.memory_space<smem>>
    %c0_15 = arith.constant 0 : index
    %c1_16 = arith.constant 1 : index
    %30 = memref.load %arg2[%c0_15, %c1_16] : memref<3x8xf32, #tpu.memory_space<smem>>
    %c0_17 = arith.constant 0 : index
    %c0_18 = arith.constant 0 : index
    %31 = vector.load %arg1[%c0_17, %c0_18] : memref<3x2xf32, #tpu.memory_space<vmem>>, vector<1x2xf32>
    %32 = vector.broadcast %30 : f32 to vector<1x2xf32>
    %33 = arith.mulf %32, %31 : vector<1x2xf32>
    %34 = vector.broadcast %29 : f32 to vector<1x2xf32>
    %35 = arith.addf %34, %33 : vector<1x2xf32>
    %c1_19 = arith.constant 1 : index
    %c1_20 = arith.constant 1 : index
    %36 = memref.load %arg2[%c1_19, %c1_20] : memref<3x8xf32, #tpu.memory_space<smem>>
    %c1_21 = arith.constant 1 : index
    %c0_22 = arith.constant 0 : index
    %37 = vector.load %arg1[%c1_21, %c0_22] : memref<3x2xf32, #tpu.memory_space<vmem>>, vector<1x2xf32>
    %38 = vector.broadcast %36 : f32 to vector<1x2xf32>
    %39 = arith.mulf %38, %37 : vector<1x2xf32>
    %40 = arith.addf %35, %39 : vector<1x2xf32>
    %c2_23 = arith.constant 2 : index
    %c1_24 = arith.constant 1 : index
    %41 = memref.load %arg2[%c2_23, %c1_24] : memref<3x8xf32, #tpu.memory_space<smem>>
    %c2_25 = arith.constant 2 : index
    %c0_26 = arith.constant 0 : index
    %42 = vector.load %arg1[%c2_25, %c0_26] : memref<3x2xf32, #tpu.memory_space<vmem>>, vector<1x2xf32>
    %43 = vector.broadcast %41 : f32 to vector<1x2xf32>
    %44 = arith.mulf %43, %42 : vector<1x2xf32>
    %45 = arith.addf %40, %44 : vector<1x2xf32>
    %46 = arith.mulf %45, %45 : vector<1x2xf32>
    %47 = arith.mulf %45, %46 : vector<1x2xf32>
    %cst_27 = arith.constant 4.471500e-02 : f32
    %48 = vector.broadcast %cst_27 : f32 to vector<1x2xf32>
    %49 = arith.mulf %47, %48 : vector<1x2xf32>
    %50 = arith.addf %45, %49 : vector<1x2xf32>
    %cst_28 = arith.constant 0.797884583 : f32
    %51 = vector.broadcast %cst_28 : f32 to vector<1x2xf32>
    %52 = arith.mulf %50, %51 : vector<1x2xf32>
    %53 = math.tanh %52 : vector<1x2xf32>
    %cst_29 = arith.constant 1.000000e+00 : f32
    %54 = vector.broadcast %cst_29 : f32 to vector<1x2xf32>
    %55 = arith.addf %53, %54 : vector<1x2xf32>
    %56 = arith.mulf %45, %55 : vector<1x2xf32>
    %c1_30 = arith.constant 1 : index
    %c0_31 = arith.constant 0 : index
    %57 = vector.load %arg4[%c1_30, %c0_31] : memref<8x2xf32, #tpu.memory_space<vmem>>, vector<1x2xf32>
    tpu.vector_store %arg4[%c1_30, %c0_31], %56 {strides = array<i32>} : memref<8x2xf32, #tpu.memory_space<vmem>>, vector<1x2xf32>,
    %c2_32 = arith.constant 2 : index
    %58 = memref.load %arg3[%c2_32] : memref<8xf32, #tpu.memory_space<smem>>
    %c0_33 = arith.constant 0 : index
    %c2_34 = arith.constant 2 : index
    %59 = memref.load %arg2[%c0_33, %c2_34] : memref<3x8xf32, #tpu.memory_space<smem>>
    %c0_35 = arith.constant 0 : index
    %c0_36 = arith.constant 0 : index
    %60 = vector.load %arg1[%c0_35, %c0_36] : memref<3x2xf32, #tpu.memory_space<vmem>>, vector<1x2xf32>
    %61 = vector.broadcast %59 : f32 to vector<1x2xf32>
    %62 = arith.mulf %61, %60 : vector<1x2xf32>
    %63 = vector.broadcast %58 : f32 to vector<1x2xf32>
    %64 = arith.addf %63, %62 : vector<1x2xf32>
    %c1_37 = arith.constant 1 : index
    %c2_38 = arith.constant 2 : index
    %65 = memref.load %arg2[%c1_37, %c2_38] : memref<3x8xf32, #tpu.memory_space<smem>>
    %c1_39 = arith.constant 1 : index
    %c0_40 = arith.constant 0 : index
    %66 = vector.load %arg1[%c1_39, %c0_40] : memref<3x2xf32, #tpu.memory_space<vmem>>, vector<1x2xf32>
    %67 = vector.broadcast %65 : f32 to vector<1x2xf32>
    %68 = arith.mulf %67, %66 : vector<1x2xf32>
    %69 = arith.addf %64, %68 : vector<1x2xf32>
    %c2_41 = arith.constant 2 : index
    %c2_42 = arith.constant 2 : index
    %70 = memref.load %arg2[%c2_41, %c2_42] : memref<3x8xf32, #tpu.memory_space<smem>>
    %c2_43 = arith.constant 2 : index
    %c0_44 = arith.constant 0 : index
    %71 = vector.load %arg1[%c2_43, %c0_44] : memref<3x2xf32, #tpu.memory_space<vmem>>, vector<1x2xf32>
    %72 = vector.broadcast %70 : f32 to vector<1x2xf32>
    %73 = arith.mulf %72, %71 : vector<1x2xf32>
    %74 = arith.addf %69, %73 : vector<1x2xf32>
    %75 = arith.mulf %74, %74 : vector<1x2xf32>
    %76 = arith.mulf %74, %75 : vector<1x2xf32>
    %cst_45 = arith.constant 4.471500e-02 : f32
    %77 = vector.broadcast %cst_45 : f32 to vector<1x2xf32>
    %78 = arith.mulf %76, %77 : vector<1x2xf32>
    %79 = arith.addf %74, %78 : vector<1x2xf32>
    %cst_46 = arith.constant 0.797884583 : f32
    %80 = vector.broadcast %cst_46 : f32 to vector<1x2xf32>
    %81 = arith.mulf %79, %80 : vector<1x2xf32>
    %82 = math.tanh %81 : vector<1x2xf32>
    %cst_47 = arith.constant 1.000000e+00 : f32
    %83 = vector.broadcast %cst_47 : f32 to vector<1x2xf32>
    %84 = arith.addf %82, %83 : vector<1x2xf32>
    %85 = arith.mulf %74, %84 : vector<1x2xf32>
    %c2_48 = arith.constant 2 : index
    %c0_49 = arith.constant 0 : index
    %86 = vector.load %arg4[%c2_48, %c0_49] : memref<8x2xf32, #tpu.memory_space<vmem>>, vector<1x2xf32>
    tpu.vector_store %arg4[%c2_48, %c0_49], %85 {strides = array<i32>} : memref<8x2xf32, #tpu.memory_space<vmem>>, vector<1x2xf32>,
    %c3 = arith.constant 3 : index
    %87 = memref.load %arg3[%c3] : memref<8xf32, #tpu.memory_space<smem>>
    %c0_50 = arith.constant 0 : index
    %c3_51 = arith.constant 3 : index
    %88 = memref.load %arg2[%c0_50, %c3_51] : memref<3x8xf32, #tpu.memory_space<smem>>
    %c0_52 = arith.constant 0 : index
    %c0_53 = arith.constant 0 : index
    %89 = vector.load %arg1[%c0_52, %c0_53] : memref<3x2xf32, #tpu.memory_space<vmem>>, vector<1x2xf32>
    %90 = vector.broadcast %88 : f32 to vector<1x2xf32>
    %91 = arith.mulf %90, %89 : vector<1x2xf32>
    %92 = vector.broadcast %87 : f32 to vector<1x2xf32>
    %93 = arith.addf %92, %91 : vector<1x2xf32>
    %c1_54 = arith.constant 1 : index
    %c3_55 = arith.constant 3 : index
    %94 = memref.load %arg2[%c1_54, %c3_55] : memref<3x8xf32, #tpu.memory_space<smem>>
    %c1_56 = arith.constant 1 : index
    %c0_57 = arith.constant 0 : index
    %95 = vector.load %arg1[%c1_56, %c0_57] : memref<3x2xf32, #tpu.memory_space<vmem>>, vector<1x2xf32>
    %96 = vector.broadcast %94 : f32 to vector<1x2xf32>
    %97 = arith.mulf %96, %95 : vector<1x2xf32>
    %98 = arith.addf %93, %97 : vector<1x2xf32>
    %c2_58 = arith.constant 2 : index
    %c3_59 = arith.constant 3 : index
    %99 = memref.load %arg2[%c2_58, %c3_59] : memref<3x8xf32, #tpu.memory_space<smem>>
    %c2_60 = arith.constant 2 : index
    %c0_61 = arith.constant 0 : index
    %100 = vector.load %arg1[%c2_60, %c0_61] : memref<3x2xf32, #tpu.memory_space<vmem>>, vector<1x2xf32>
    %101 = vector.broadcast %99 : f32 to vector<1x2xf32>
    %102 = arith.mulf %101, %100 : vector<1x2xf32>
    %103 = arith.addf %98, %102 : vector<1x2xf32>
    %104 = arith.mulf %103, %103 : vector<1x2xf32>
    %105 = arith.mulf %103, %104 : vector<1x2xf32>
    %cst_62 = arith.constant 4.471500e-02 : f32
    %106 = vector.broadcast %cst_62 : f32 to vector<1x2xf32>
    %107 = arith.mulf %105, %106 : vector<1x2xf32>
    %108 = arith.addf %103, %107 : vector<1x2xf32>
    %cst_63 = arith.constant 0.797884583 : f32
    %109 = vector.broadcast %cst_63 : f32 to vector<1x2xf32>
    %110 = arith.mulf %108, %109 : vector<1x2xf32>
    %111 = math.tanh %110 : vector<1x2xf32>
    %cst_64 = arith.constant 1.000000e+00 : f32
    %112 = vector.broadcast %cst_64 : f32 to vector<1x2xf32>
    %113 = arith.addf %111, %112 : vector<1x2xf32>
    %114 = arith.mulf %103, %113 : vector<1x2xf32>
    %c3_65 = arith.constant 3 : index
    %c0_66 = arith.constant 0 : index
    %115 = vector.load %arg4[%c3_65, %c0_66] : memref<8x2xf32, #tpu.memory_space<vmem>>, vector<1x2xf32>
    tpu.vector_store %arg4[%c3_65, %c0_66], %114 {strides = array<i32>} : memref<8x2xf32, #tpu.memory_space<vmem>>, vector<1x2xf32>,
    %c4 = arith.constant 4 : index
    %116 = memref.load %arg3[%c4] : memref<8xf32, #tpu.memory_space<smem>>
    %c0_67 = arith.constant 0 : index
    %c4_68 = arith.constant 4 : index
    %117 = memref.load %arg2[%c0_67, %c4_68] : memref<3x8xf32, #tpu.memory_space<smem>>
    %c0_69 = arith.constant 0 : index
    %c0_70 = arith.constant 0 : index
    %118 = vector.load %arg1[%c0_69, %c0_70] : memref<3x2xf32, #tpu.memory_space<vmem>>, vector<1x2xf32>
    %119 = vector.broadcast %117 : f32 to vector<1x2xf32>
    %120 = arith.mulf %119, %118 : vector<1x2xf32>
    %121 = vector.broadcast %116 : f32 to vector<1x2xf32>
    %122 = arith.addf %121, %120 : vector<1x2xf32>
    %c1_71 = arith.constant 1 : index
    %c4_72 = arith.constant 4 : index
    %123 = memref.load %arg2[%c1_71, %c4_72] : memref<3x8xf32, #tpu.memory_space<smem>>
    %c1_73 = arith.constant 1 : index
    %c0_74 = arith.constant 0 : index
    %124 = vector.load %arg1[%c1_73, %c0_74] : memref<3x2xf32, #tpu.memory_space<vmem>>, vector<1x2xf32>
    %125 = vector.broadcast %123 : f32 to vector<1x2xf32>
    %126 = arith.mulf %125, %124 : vector<1x2xf32>
    %127 = arith.addf %122, %126 : vector<1x2xf32>
    %c2_75 = arith.constant 2 : index
    %c4_76 = arith.constant 4 : index
    %128 = memref.load %arg2[%c2_75, %c4_76] : memref<3x8xf32, #tpu.memory_space<smem>>
    %c2_77 = arith.constant 2 : index
    %c0_78 = arith.constant 0 : index
    %129 = vector.load %arg1[%c2_77, %c0_78] : memref<3x2xf32, #tpu.memory_space<vmem>>, vector<1x2xf32>
    %130 = vector.broadcast %128 : f32 to vector<1x2xf32>
    %131 = arith.mulf %130, %129 : vector<1x2xf32>
    %132 = arith.addf %127, %131 : vector<1x2xf32>
    %133 = arith.mulf %132, %132 : vector<1x2xf32>
    %134 = arith.mulf %132, %133 : vector<1x2xf32>
    %cst_79 = arith.constant 4.471500e-02 : f32
    %135 = vector.broadcast %cst_79 : f32 to vector<1x2xf32>
    %136 = arith.mulf %134, %135 : vector<1x2xf32>
    %137 = arith.addf %132, %136 : vector<1x2xf32>
    %cst_80 = arith.constant 0.797884583 : f32
    %138 = vector.broadcast %cst_80 : f32 to vector<1x2xf32>
    %139 = arith.mulf %137, %138 : vector<1x2xf32>
    %140 = math.tanh %139 : vector<1x2xf32>
    %cst_81 = arith.constant 1.000000e+00 : f32
    %141 = vector.broadcast %cst_81 : f32 to vector<1x2xf32>
    %142 = arith.addf %140, %141 : vector<1x2xf32>
    %143 = arith.mulf %132, %142 : vector<1x2xf32>
    %c4_82 = arith.constant 4 : index
    %c0_83 = arith.constant 0 : index
    %144 = vector.load %arg4[%c4_82, %c0_83] : memref<8x2xf32, #tpu.memory_space<vmem>>, vector<1x2xf32>
    tpu.vector_store %arg4[%c4_82, %c0_83], %143 {strides = array<i32>} : memref<8x2xf32, #tpu.memory_space<vmem>>, vector<1x2xf32>,
    %c5 = arith.constant 5 : index
    %145 = memref.load %arg3[%c5] : memref<8xf32, #tpu.memory_space<smem>>
    %c0_84 = arith.constant 0 : index
    %c5_85 = arith.constant 5 : index
    %146 = memref.load %arg2[%c0_84, %c5_85] : memref<3x8xf32, #tpu.memory_space<smem>>
    %c0_86 = arith.constant 0 : index
    %c0_87 = arith.constant 0 : index
    %147 = vector.load %arg1[%c0_86, %c0_87] : memref<3x2xf32, #tpu.memory_space<vmem>>, vector<1x2xf32>
    %148 = vector.broadcast %146 : f32 to vector<1x2xf32>
    %149 = arith.mulf %148, %147 : vector<1x2xf32>
    %150 = vector.broadcast %145 : f32 to vector<1x2xf32>
    %151 = arith.addf %150, %149 : vector<1x2xf32>
    %c1_88 = arith.constant 1 : index
    %c5_89 = arith.constant 5 : index
    %152 = memref.load %arg2[%c1_88, %c5_89] : memref<3x8xf32, #tpu.memory_space<smem>>
    %c1_90 = arith.constant 1 : index
    %c0_91 = arith.constant 0 : index
    %153 = vector.load %arg1[%c1_90, %c0_91] : memref<3x2xf32, #tpu.memory_space<vmem>>, vector<1x2xf32>
    %154 = vector.broadcast %152 : f32 to vector<1x2xf32>
    %155 = arith.mulf %154, %153 : vector<1x2xf32>
    %156 = arith.addf %151, %155 : vector<1x2xf32>
    %c2_92 = arith.constant 2 : index
    %c5_93 = arith.constant 5 : index
    %157 = memref.load %arg2[%c2_92, %c5_93] : memref<3x8xf32, #tpu.memory_space<smem>>
    %c2_94 = arith.constant 2 : index
    %c0_95 = arith.constant 0 : index
    %158 = vector.load %arg1[%c2_94, %c0_95] : memref<3x2xf32, #tpu.memory_space<vmem>>, vector<1x2xf32>
    %159 = vector.broadcast %157 : f32 to vector<1x2xf32>
    %160 = arith.mulf %159, %158 : vector<1x2xf32>
    %161 = arith.addf %156, %160 : vector<1x2xf32>
    %162 = arith.mulf %161, %161 : vector<1x2xf32>
    %163 = arith.mulf %161, %162 : vector<1x2xf32>
    %cst_96 = arith.constant 4.471500e-02 : f32
    %164 = vector.broadcast %cst_96 : f32 to vector<1x2xf32>
    %165 = arith.mulf %163, %164 : vector<1x2xf32>
    %166 = arith.addf %161, %165 : vector<1x2xf32>
    %cst_97 = arith.constant 0.797884583 : f32
    %167 = vector.broadcast %cst_97 : f32 to vector<1x2xf32>
    %168 = arith.mulf %166, %167 : vector<1x2xf32>
    %169 = math.tanh %168 : vector<1x2xf32>
    %cst_98 = arith.constant 1.000000e+00 : f32
    %170 = vector.broadcast %cst_98 : f32 to vector<1x2xf32>
    %171 = arith.addf %169, %170 : vector<1x2xf32>
    %172 = arith.mulf %161, %171 : vector<1x2xf32>
    %c5_99 = arith.constant 5 : index
    %c0_100 = arith.constant 0 : index
    %173 = vector.load %arg4[%c5_99, %c0_100] : memref<8x2xf32, #tpu.memory_space<vmem>>, vector<1x2xf32>
    tpu.vector_store %arg4[%c5_99, %c0_100], %172 {strides = array<i32>} : memref<8x2xf32, #tpu.memory_space<vmem>>, vector<1x2xf32>,
    %c6 = arith.constant 6 : index
    %174 = memref.load %arg3[%c6] : memref<8xf32, #tpu.memory_space<smem>>
    %c0_101 = arith.constant 0 : index
    %c6_102 = arith.constant 6 : index
    %175 = memref.load %arg2[%c0_101, %c6_102] : memref<3x8xf32, #tpu.memory_space<smem>>
    %c0_103 = arith.constant 0 : index
    %c0_104 = arith.constant 0 : index
    %176 = vector.load %arg1[%c0_103, %c0_104] : memref<3x2xf32, #tpu.memory_space<vmem>>, vector<1x2xf32>
    %177 = vector.broadcast %175 : f32 to vector<1x2xf32>
    %178 = arith.mulf %177, %176 : vector<1x2xf32>
    %179 = vector.broadcast %174 : f32 to vector<1x2xf32>
    %180 = arith.addf %179, %178 : vector<1x2xf32>
    %c1_105 = arith.constant 1 : index
    %c6_106 = arith.constant 6 : index
    %181 = memref.load %arg2[%c1_105, %c6_106] : memref<3x8xf32, #tpu.memory_space<smem>>
    %c1_107 = arith.constant 1 : index
    %c0_108 = arith.constant 0 : index
    %182 = vector.load %arg1[%c1_107, %c0_108] : memref<3x2xf32, #tpu.memory_space<vmem>>, vector<1x2xf32>
    %183 = vector.broadcast %181 : f32 to vector<1x2xf32>
    %184 = arith.mulf %183, %182 : vector<1x2xf32>
    %185 = arith.addf %180, %184 : vector<1x2xf32>
    %c2_109 = arith.constant 2 : index
    %c6_110 = arith.constant 6 : index
    %186 = memref.load %arg2[%c2_109, %c6_110] : memref<3x8xf32, #tpu.memory_space<smem>>
    %c2_111 = arith.constant 2 : index
    %c0_112 = arith.constant 0 : index
    %187 = vector.load %arg1[%c2_111, %c0_112] : memref<3x2xf32, #tpu.memory_space<vmem>>, vector<1x2xf32>
    %188 = vector.broadcast %186 : f32 to vector<1x2xf32>
    %189 = arith.mulf %188, %187 : vector<1x2xf32>
    %190 = arith.addf %185, %189 : vector<1x2xf32>
    %191 = arith.mulf %190, %190 : vector<1x2xf32>
    %192 = arith.mulf %190, %191 : vector<1x2xf32>
    %cst_113 = arith.constant 4.471500e-02 : f32
    %193 = vector.broadcast %cst_113 : f32 to vector<1x2xf32>
    %194 = arith.mulf %192, %193 : vector<1x2xf32>
    %195 = arith.addf %190, %194 : vector<1x2xf32>
    %cst_114 = arith.constant 0.797884583 : f32
    %196 = vector.broadcast %cst_114 : f32 to vector<1x2xf32>
    %197 = arith.mulf %195, %196 : vector<1x2xf32>
    %198 = math.tanh %197 : vector<1x2xf32>
    %cst_115 = arith.constant 1.000000e+00 : f32
    %199 = vector.broadcast %cst_115 : f32 to vector<1x2xf32>
    %200 = arith.addf %198, %199 : vector<1x2xf32>
    %201 = arith.mulf %190, %200 : vector<1x2xf32>
    %c6_116 = arith.constant 6 : index
    %c0_117 = arith.constant 0 : index
    %202 = vector.load %arg4[%c6_116, %c0_117] : memref<8x2xf32, #tpu.memory_space<vmem>>, vector<1x2xf32>
    tpu.vector_store %arg4[%c6_116, %c0_117], %201 {strides = array<i32>} : memref<8x2xf32, #tpu.memory_space<vmem>>, vector<1x2xf32>,
    %c7 = arith.constant 7 : index
    %203 = memref.load %arg3[%c7] : memref<8xf32, #tpu.memory_space<smem>>
    %c0_118 = arith.constant 0 : index
    %c7_119 = arith.constant 7 : index
    %204 = memref.load %arg2[%c0_118, %c7_119] : memref<3x8xf32, #tpu.memory_space<smem>>
    %c0_120 = arith.constant 0 : index
    %c0_121 = arith.constant 0 : index
    %205 = vector.load %arg1[%c0_120, %c0_121] : memref<3x2xf32, #tpu.memory_space<vmem>>, vector<1x2xf32>
    %206 = vector.broadcast %204 : f32 to vector<1x2xf32>
    %207 = arith.mulf %206, %205 : vector<1x2xf32>
    %208 = vector.broadcast %203 : f32 to vector<1x2xf32>
    %209 = arith.addf %208, %207 : vector<1x2xf32>
    %c1_122 = arith.constant 1 : index
    %c7_123 = arith.constant 7 : index
    %210 = memref.load %arg2[%c1_122, %c7_123] : memref<3x8xf32, #tpu.memory_space<smem>>
    %c1_124 = arith.constant 1 : index
    %c0_125 = arith.constant 0 : index
    %211 = vector.load %arg1[%c1_124, %c0_125] : memref<3x2xf32, #tpu.memory_space<vmem>>, vector<1x2xf32>
    %212 = vector.broadcast %210 : f32 to vector<1x2xf32>
    %213 = arith.mulf %212, %211 : vector<1x2xf32>
    %214 = arith.addf %209, %213 : vector<1x2xf32>
    %c2_126 = arith.constant 2 : index
    %c7_127 = arith.constant 7 : index
    %215 = memref.load %arg2[%c2_126, %c7_127] : memref<3x8xf32, #tpu.memory_space<smem>>
    %c2_128 = arith.constant 2 : index
    %c0_129 = arith.constant 0 : index
    %216 = vector.load %arg1[%c2_128, %c0_129] : memref<3x2xf32, #tpu.memory_space<vmem>>, vector<1x2xf32>
    %217 = vector.broadcast %215 : f32 to vector<1x2xf32>
    %218 = arith.mulf %217, %216 : vector<1x2xf32>
    %219 = arith.addf %214, %218 : vector<1x2xf32>
    %220 = arith.mulf %219, %219 : vector<1x2xf32>
    %221 = arith.mulf %219, %220 : vector<1x2xf32>
    %cst_130 = arith.constant 4.471500e-02 : f32
    %222 = vector.broadcast %cst_130 : f32 to vector<1x2xf32>
    %223 = arith.mulf %221, %222 : vector<1x2xf32>
    %224 = arith.addf %219, %223 : vector<1x2xf32>
    %cst_131 = arith.constant 0.797884583 : f32
    %225 = vector.broadcast %cst_131 : f32 to vector<1x2xf32>
    %226 = arith.mulf %224, %225 : vector<1x2xf32>
    %227 = math.tanh %226 : vector<1x2xf32>
    %cst_132 = arith.constant 1.000000e+00 : f32
    %228 = vector.broadcast %cst_132 : f32 to vector<1x2xf32>
    %229 = arith.addf %227, %228 : vector<1x2xf32>
    %230 = arith.mulf %219, %229 : vector<1x2xf32>
    %c7_133 = arith.constant 7 : index
    %c0_134 = arith.constant 0 : index
    %231 = vector.load %arg4[%c7_133, %c0_134] : memref<8x2xf32, #tpu.memory_space<vmem>>, vector<1x2xf32>
    tpu.vector_store %arg4[%c7_133, %c0_134], %230 {strides = array<i32>} : memref<8x2xf32, #tpu.memory_space<vmem>>, vector<1x2xf32>,
    return
  }
  func.func @transform_0(%arg0: i32) -> (i32, i32) {
    %c0_i32 = arith.constant 0 : i32
    %c0_i32_0 = arith.constant 0 : i32
    return %c0_i32, %arg0 : i32, i32
  }
  func.func @transform_1(%arg0: i32) -> (i32, i32) {
    %c0_i32 = arith.constant 0 : i32
    %c0_i32_0 = arith.constant 0 : i32
    %c0_i32_1 = arith.constant 0 : i32
    return %c0_i32, %c0_i32_0 : i32, i32
  }
  func.func @transform_2(%arg0: i32) -> i32 {
    %c0_i32 = arith.constant 0 : i32
    %c0_i32_0 = arith.constant 0 : i32
    return %c0_i32 : i32
  }
  func.func @transform_3(%arg0: i32) -> (i32, i32) {
    %c0_i32 = arith.constant 0 : i32
    %c0_i32_0 = arith.constant 0 : i32
    return %c0_i32, %arg0 : i32, i32
  }
}

</mosaic_0001>

<bundles_post_ra>
// kernel: tpu_custom_call.1
= control target key start
LH: loop header
LB: loop body
LE: loop exit
PB: predicated region body
PF: predicated region fallthrough
CT: control target
= control target key end

     0   :  { %8 = vsyncpa [#allocation3], 0  ;;  %s570_s0 = inlined_call_operand.vmem [shape: f32[3,2], index: 0, kind: input, shape index: {}]   ;;  %s571_s1 = inlined_call_operand.vmem [shape: f32[3,8], index: 1, kind: input, shape index: {}]   ;;  %s572_s2 = inlined_call_operand.vmem [shape: f32[8], index: 2, kind: input, shape index: {}]   ;;  %s573_s3 = inlined_call_operand.vmem [shape: f32[8,2], index: 3, kind: output, shape index: {}]  }
   0x1   :  { %s18_s14 = sshll.u32 %s571_s1, 4  ;;  %s19_s14 = int_to_ptr.vmem [resolvable:$true] %s18_s14 }
   0x2   :  { %9 = vsyncpa [#allocation5], 0  ;;  %s28_s17 = sshll.u32 %s572_s2, 4  ;;  %s302_s18 = scalar_lea.vmem %s19_s14, 64  ;;  %s29_s17 = int_to_ptr.vmem [resolvable:$true] %s28_s17 }
   0x3   :  { %p303_p0 = scmp.ne.s32.totalorder %s19_s14, %s302_s18  ;;  %p307_p1 = scmp.lt.s32.totalorder %s19_s14, %s19_s14 }
   0x4   :  { %p308_p2 = scmp.lt.s32.totalorder %s302_s18, %s302_s18 }
   0x6   :  { %p309_p3 = por %p308_p2, %p307_p1 }
   0x8   :  { %p310_p4 = pnand %p309_p3, %p303_p0 }
   0xa   :  { %313 = shalt.err (!%p310_p4)
}
   0xb   :  { %s330_s19 = smov [#allocation2]   ;;  %s314_s20 = scalar_lea.vmem %s29_s17, 16 }
   0xc   :  { %21 = dma.vmem_to_smem %s19_s14, 64, %s330_s19, [#allocation3]  }
   0xd   :  { %p315_p5 = scmp.ne.s32.totalorder %s29_s17, %s314_s20  ;;  %p319_p6 = scmp.lt.s32.totalorder %s29_s17, %s29_s17 }
   0xe   :  { %p320_p7 = scmp.lt.s32.totalorder %s314_s20, %s314_s20 }
  0x10   :  { %p321_p8 = por %p320_p7, %p319_p6 }
  0x12   :  { %p322_p9 = pnand %p321_p8, %p315_p5 }
  0x14   :  { %325 = shalt.err (!%p322_p9)
}
  0x15   :  { %s331_s1 = smov [#allocation4]  }
  0x16   :  { %31 = dma.vmem_to_smem %s29_s17, 16, %s331_s1, [#allocation5]  }
  0x17   :  { %326 = dma.done.wait [#allocation3], 64  }
  0x18   :  { %327 = vsyncadd [#allocation3], 4294967232 }
  0x19   :  { %328 = dma.done.wait [#allocation5], 16  }
  0x1a   :  { %329 = vsyncadd [#allocation5], 4294967280 }
  0x1b   :  { %38 = sfence }
  0x1c   :  { %s39_s2 = sld [smem:[#allocation4]]  ;;  %v41_v0 = vld [vmem:[%s570_s0] sm:$0x1]  ;;  %v47_v1 = vld [vmem:[%s570_s0 + $0x1] sm:$0x1]  ;;  %vm64_vm0 = vcmask 8192  }
  0x1d   :  { %s40_s21 = sld [smem:[#allocation2]]  ;;  %v52_v4 = vld [vmem:[%s570_s0 + $0x2] sm:$0x1]  ;;  %v68_v9 = vld [vmem:[%s570_s0] sm:$0x1] }
  0x1e   :  { %s254_s22 = sld [smem:[#allocation2 + $0x80]]  ;;  %v74_v12 = vld [vmem:[%s570_s0 + $0x1] sm:$0x1]  ;;  %v79_v15 = vld [vmem:[%s570_s0 + $0x2] sm:$0x1] }
  0x1f   :  { %s255_s23 = sld [smem:[#allocation2 + $0x100]]  ;;  %v94_v21 = vld [vmem:[%s570_s0] sm:$0x1]  ;;  %v100_v25 = vld [vmem:[%s570_s0 + $0x1] sm:$0x1] }
  0x20   :  { %s358_s24 = sld [smem:[#allocation4 + $0x1]]  ;;  %v105_v28 = vld [vmem:[%s570_s0 + $0x2] sm:$0x1]  ;;  %v120_v35 = vld [vmem:[%s570_s0] sm:$0x1] }
  0x21   :  { %s257_s27 = sld [smem:[#allocation2 + $0x1]]  ;;  %v126_v42 = vld [vmem:[%s570_s0 + $0x1] sm:$0x1]  ;;  %v131_v47 = vld [vmem:[%s570_s0 + $0x2] sm:$0x1] }
  0x22   :  { %s258_s30 = sld [smem:[#allocation2 + $0x81]]  ;;  %v44_v3 = vstv %s39_s2  ;;  %v146_v50 = vld [vmem:[%s570_s0] sm:$0x1]  ;;  %v152_v59 = vld [vmem:[%s570_s0 + $0x1] sm:$0x1] }
  0x23   :  { %v42_v2 = vstv %s40_s21  ;;  %s259_s6 = sld [smem:[#allocation2 + $0x101]]  ;;  %v157_v60 = vld [vmem:[%s570_s0 + $0x2] sm:$0x1] }
  0x24   :  { %v43_v5 = vmul.f32 %v42_v2, %v41_v0  ;;  %v48_v6 = vstv %s254_s22  ;;  %s369_s7 = sld [smem:[#allocation4 + $0x2]] }
  0x25   :  { %v49_v7 = vmul.f32 %v48_v6, %v47_v1  ;;  %v53_v8 = vstv %s255_s23  ;;  %s261_s10 = sld [smem:[#allocation2 + $0x2]] }
  0x26   :  { %v45_v10 = vadd.f32 %v44_v3, %v43_v5  ;;  %v54_v11 = vmul.f32 %v53_v8, %v52_v4  ;;  %s262_s13 = sld [smem:[#allocation2 + $0x82]]  ;;  %v71_v14 = vstv %s358_s24  ;;  %v172_v4 = vld [vmem:[%s570_s0] sm:$0x1] }
  0x27   :  { %v69_v13 = vstv %s257_s27  ;;  %s263_s16 = sld [smem:[#allocation2 + $0x102]] }
  0x28   :  { %v50_v16 = vadd.f32 %v49_v7, %v45_v10  ;;  %v70_v17 = vmul.f32 %v69_v13, %v68_v9  ;;  %v75_v18 = vstv %s258_s30  ;;  %s381_s17 = sld [smem:[#allocation4 + $0x3]]  ;;  %v183_v13 = vld [vmem:[%s570_s0 + $0x2] sm:$0x1] }
  0x29   :  { %v76_v19 = vmul.f32 %v75_v18, %v74_v12  ;;  %v80_v20 = vstv %s259_s6  ;;  %s386_s20 = sld [smem:[#allocation2 + $0x3]]  ;;  %v178_v12 = vld [vmem:[%s570_s0 + $0x1] sm:$0x1] }
  0x2a   :  { %v388_v22 = vadd.f32 %v54_v11, %v50_v16  ;;  %v72_v23 = vadd.f32 %v71_v14, %v70_v17  ;;  %v81_v24 = vmul.f32 %v80_v20, %v79_v15  ;;  %s393_s21 = sld [smem:[#allocation2 + $0x83]]  ;;  %v97_v27 = vstv %s369_s7 }
  0x2b   :  { %v95_v26 = vstv %s261_s10  ;;  %s399_s24 = sld [smem:[#allocation2 + $0x103]] }
  0x2c   :  { %v56_v29 = vmul.f32 %v388_v22, %v388_v22  ;;  %v77_v30 = vadd.f32 %v76_v19, %v72_v23  ;;  %v96_v31 = vmul.f32 %v95_v26, %v94_v21  ;;  %v101_v32 = vstv %s262_s13  ;;  %s403_s25 = sld [smem:[#allocation4 + $0x4]]  ;;  %v198_v23 = vld [vmem:[%s570_s0] sm:$0x1] }
  0x2d   :  { %v102_v33 = vmul.f32 %v101_v32, %v100_v25  ;;  %v106_v34 = vstv %s263_s16  ;;  %s408_s28 = sld [smem:[#allocation2 + $0x4]] }
  0x2e   :  { %v57_v36 = vmul.f32 %v56_v29, %v388_v22  ;;  %v411_v37 = vadd.f32 %v81_v24, %v77_v30  ;;  %v98_v38 = vadd.f32 %v97_v27, %v96_v31  ;;  %v107_v39 = vmul.f32 %v106_v34, %v105_v28  ;;  %s413_s29 = sld [smem:[#allocation2 + $0x84]]  ;;  %v204_v31 = vld [vmem:[%s570_s0 + $0x1] sm:$0x1] }
  0x2f   :  { %v121_v40 = vstv %s386_s20  ;;  %v123_v41 = vstv %s381_s17  ;;  %s420_s5 = sld [smem:[#allocation2 + $0x104]] }
  0x30   :  { %v58_v43 = vmul.f32 0.044715, %v57_v36  ;;  %v83_v44 = vmul.f32 %v411_v37, %v411_v37  ;;  %v103_v45 = vadd.f32 %v102_v33, %v98_v38  ;;  %v122_v46 = vmul.f32 %v121_v40, %v120_v35  ;;  %s427_s8 = sld [smem:[#allocation4 + $0x5]]  ;;  %v209_v36 = vld [vmem:[%s570_s0 + $0x2] sm:$0x1] }
  0x31   :  { %v127_v48 = vstv %s393_s21  ;;  %v132_v49 = vstv %s399_s24  ;;  %s434_s11 = sld [smem:[#allocation2 + $0x5]] }
  0x32   :  { %v59_v51 = vadd.f32 %v58_v43, %v388_v22  ;;  %v84_v52 = vmul.f32 %v83_v44, %v411_v37  ;;  %v438_v53 = vadd.f32 %v107_v39, %v103_v45  ;;  %v124_v54 = vadd.f32 %v123_v41, %v122_v46  ;;  %s440_s12 = sld [smem:[#allocation2 + $0x85]] }
  0x33   :  { %v128_v55 = vmul.f32 %v127_v48, %v126_v42  ;;  %v133_v56 = vmul.f32 %v132_v49, %v131_v47  ;;  %v147_v57 = vstv %s408_s28  ;;  %v149_v58 = vstv %s403_s25  ;;  %s450_s17 = sld [smem:[#allocation2 + $0x105]]  ;;  %v224_v42 = vld [vmem:[%s570_s0] sm:$0x1] }
  0x34   :  { %v60_v61 = vmul.f32 0.7978846, %v59_v51  ;;  %v85_v62 = vmul.f32 0.044715, %v84_v52  ;;  %v109_v63 = vmul.f32 %v438_v53, %v438_v53  ;;  %v148_v0 = vmul.f32 %v147_v57, %v146_v50  ;;  %s454_s18 = sld [smem:[#allocation4 + $0x6]] }
  0x35   :  { %v129_v1 = vadd.f32 %v128_v55, %v124_v54  ;;  %v153_v2 = vstv %s413_s29  ;;  %v158_v3 = vstv %s420_s5  ;;  %s461_s1 = sld [smem:[#allocation2 + $0x6]]  ;;  %v230_v50 = vld [vmem:[%s570_s0 + $0x1] sm:$0x1] }
  0x36   :  { %286 = vtanh.f32 %v60_v61  ;;  %v86_v5 = vadd.f32 %v85_v62, %v411_v37  ;;  %v110_v6 = vmul.f32 %v109_v63, %v438_v53  ;;  %v150_v7 = vadd.f32 %v149_v58, %v148_v0  ;;  %s465_s2 = sld [smem:[#allocation2 + $0x86]] }
  0x37   :  { %v467_v8 = vadd.f32 %v133_v56, %v129_v1  ;;  %v154_v9 = vmul.f32 %v153_v2, %v152_v59  ;;  %v159_v10 = vmul.f32 %v158_v3, %v157_v60  ;;  %v173_v11 = vstv %s434_s11  ;;  %s476_s25 = sld [smem:[#allocation2 + $0x106]]  ;;  %v235_v56 = vld [vmem:[%s570_s0 + $0x2] sm:$0x1] }
  0x38   :  { %v87_v14 = vmul.f32 0.7978846, %v86_v5  ;;  %v111_v15 = vmul.f32 0.044715, %v110_v6  ;;  %v174_v16 = vmul.f32 %v173_v11, %v172_v4  ;;  %v175_v17 = vstv %s427_s8  ;;  %s479_s26 = sld [smem:[#allocation4 + $0x7]] }
  0x39   :  { %v135_v18 = vmul.f32 %v467_v8, %v467_v8  ;;  %v155_v19 = vadd.f32 %v154_v9, %v150_v7  ;;  %v179_v20 = vstv %s440_s12  ;;  %v184_v21 = vstv %s450_s17  ;;  %s488_s29 = sld [smem:[#allocation2 + $0x7]] }
  0x3a   :  { %288 = vtanh.f32 %v87_v14  ;;  %v112_v24 = vadd.f32 %v111_v15, %v438_v53  ;;  %v176_v25 = vadd.f32 %v175_v17, %v174_v16  ;;  %v180_v26 = vmul.f32 %v179_v20, %v178_v12  ;;  %s491_s30 = sld [smem:[#allocation2 + $0x87]] }
  0x3b   :  { %v136_v27 = vmul.f32 %v135_v18, %v467_v8  ;;  %v494_v28 = vadd.f32 %v159_v10, %v155_v19  ;;  %v185_v29 = vmul.f32 %v184_v21, %v183_v13  ;;  %v199_v30 = vstv %s461_s1  ;;  %s500_s6 = sld [smem:[#allocation2 + $0x107]] }
  0x3c   :  { %v113_v32 = vmul.f32 0.7978846, %v112_v24  ;;  %v181_v33 = vadd.f32 %v180_v26, %v176_v25  ;;  %v200_v34 = vmul.f32 %v199_v30, %v198_v23  ;;  %v201_v35 = vstv %s454_s18 }
  0x3d   :  { %v137_v38 = vmul.f32 0.044715, %v136_v27  ;;  %v161_v39 = vmul.f32 %v494_v28, %v494_v28  ;;  %v205_v40 = vstv %s465_s2  ;;  %v210_v41 = vstv %s476_s25 }
  0x3e   :  { %290 = vtanh.f32 %v113_v32  ;;  %v513_v43 = vadd.f32 %v185_v29, %v181_v33  ;;  %v202_v44 = vadd.f32 %v201_v35, %v200_v34  ;;  %v206_v45 = vmul.f32 %v205_v40, %v204_v31 }
  0x3f   :  { %v138_v46 = vadd.f32 %v137_v38, %v467_v8  ;;  %v162_v47 = vmul.f32 %v161_v39, %v494_v28  ;;  %v211_v48 = vmul.f32 %v210_v41, %v209_v36  ;;  %v225_v49 = vstv %s488_s29 }
  0x40   :  { %v187_v51 = vmul.f32 %v513_v43, %v513_v43  ;;  %v207_v52 = vadd.f32 %v206_v45, %v202_v44  ;;  %v226_v54 = vmul.f32 %v225_v49, %v224_v42  ;;  %v227_v55 = vstv %s479_s26 }
  0x41   :  { %v139_v57 = vmul.f32 0.7978846, %v138_v46  ;;  %v163_v58 = vmul.f32 0.044715, %v162_v47  ;;  %v231_v59 = vstv %s491_s30  ;;  %v236_v60 = vstv %s500_s6 }
  0x42   :  { %v188_v61 = vmul.f32 %v187_v51, %v513_v43  ;;  %v212_v62 = vadd.f32 %v211_v48, %v207_v52  ;;  %v228_v63 = vadd.f32 %v227_v55, %v226_v54  ;;  %v232_v0 = vmul.f32 %v231_v59, %v230_v50 }
  0x43   :  { %v287_v1 = vpop.eup %286  ;;  %292 = vtanh.f32 %v139_v57  ;;  %v164_v2 = vadd.f32 %v163_v58, %v494_v28  ;;  %v237_v3 = vmul.f32 %v236_v60, %v235_v56 }
  0x44   :  { %v62_v4 = vadd.f32 1.0, %v287_v1  ;;  %v189_v5 = vmul.f32 0.044715, %v188_v61  ;;  %v213_v6 = vmul.f32 %v212_v62, %v212_v62  ;;  %v233_v7 = vadd.f32 %v232_v0, %v228_v63 }
  0x45   :  { %v165_v9 = vmul.f32 0.7978846, %v164_v2 }
  0x46   :  { %v63_v10 = vmul.f32 %v62_v4, %v388_v22  ;;  %v190_v11 = vadd.f32 %v189_v5, %v513_v43  ;;  %v214_v12 = vmul.f32 %v213_v6, %v212_v62  ;;  %v238_v13 = vadd.f32 %v237_v3, %v233_v7 }
  0x47   :  { %v289_v14 = vpop.eup %288  ;;  %294 = vtanh.f32 %v165_v9 }
  0x48   :  { %65 = vst.msk [vmem:[%s573_s3] sm:$0x1] %vm64_vm0, %v63_v10  ;;  %v89_v15 = vadd.f32 1.0, %v289_v14  ;;  %v191_v16 = vmul.f32 0.7978846, %v190_v11  ;;  %v239_v18 = vmul.f32 %v238_v13, %v238_v13 }
  0x49   :  { %v215_v17 = vmul.f32 0.044715, %v214_v12 }
  0x4a   :  { %v90_v19 = vmul.f32 %v89_v15, %v411_v37  ;;  %296 = vtanh.f32 %v191_v16  ;;  %v240_v22 = vmul.f32 %v239_v18, %v238_v13 }
  0x4b   :  { %v216_v20 = vadd.f32 %v215_v17, %v212_v62  ;;  %v291_v21 = vpop.eup %290 }
  0x4c   :  { %91 = vst.msk [vmem:[%s573_s3 + $0x1] sm:$0x1] %vm64_vm0, %v90_v19  ;;  %v115_v23 = vadd.f32 1.0, %v291_v21  ;;  %v241_v25 = vmul.f32 0.044715, %v240_v22 }
  0x4d   :  { %v217_v24 = vmul.f32 0.7978846, %v216_v20 }
  0x4e   :  { %v116_v26 = vmul.f32 %v115_v23, %v438_v53  ;;  %v242_v27 = vadd.f32 %v241_v25, %v238_v13 }
  0x4f   :  { %298 = vtanh.f32 %v217_v24 }
  0x50   :  { %v293_v29 = vpop.eup %292  ;;  %117 = vst.msk [vmem:[%s573_s3 + $0x2] sm:$0x1] %vm64_vm0, %v116_v26  ;;  %v243_v37 = vmul.f32 0.7978846, %v242_v27 }
  0x51   :  { %v141_v30 = vadd.f32 1.0, %v293_v29 }
  0x52   :  { %300 = vtanh.f32 %v243_v37 }
  0x53   :  { %v142_v31 = vmul.f32 %v141_v30, %v467_v8 }
  0x54   :  { %v295_v32 = vpop.eup %294 }
  0x55   :  { %143 = vst.msk [vmem:[%s573_s3 + $0x3] sm:$0x1] %vm64_vm0, %v142_v31  ;;  %v167_v53 = vadd.f32 1.0, %v295_v32 }
  0x57   :  { %v297_v33 = vpop.eup %296  ;;  %v168_v34 = vmul.f32 %v167_v53, %v494_v28 }
  0x58   :  { %v193_v35 = vadd.f32 1.0, %v297_v33 }
  0x59   :  { %169 = vst.msk [vmem:[%s573_s3 + $0x4] sm:$0x1] %vm64_vm0, %v168_v34 }
  0x5a   :  { %v194_v36 = vmul.f32 %v193_v35, %v513_v43 }
  0x5c   :  { %v299_v38 = vpop.eup %298  ;;  %195 = vst.msk [vmem:[%s573_s3 + $0x5] sm:$0x1] %vm64_vm0, %v194_v36 }
  0x5d   :  { %v219_v8 = vadd.f32 1.0, %v299_v38 }
  0x5f   :  { %v220_v39 = vmul.f32 %v219_v8, %v212_v62  ;;  %v301_v40 = vpop.eup %300 }
  0x60   :  { %v245_v28 = vadd.f32 1.0, %v301_v40 }
  0x61   :  { %221 = vst.msk [vmem:[%s573_s3 + $0x6] sm:$0x1] %vm64_vm0, %v220_v39 }
  0x62   :  { %v246_v41 = vmul.f32 %v245_v28, %v238_v13 }
  0x64   :  { %247 = vst.msk [vmem:[%s573_s3 + $0x7] sm:$0x1] %vm64_vm0, %v246_v41 }
  0x65   :  { %252 = vsyncpa [#allocation3], 1 }
  0x66   :  { %253 = vsyncpa [#allocation5], 1 }

</bundles_post_ra>
